<compile_context>
chip_gen: v6e
topology: v6e:2x2x1
jax: 0.10.0
libtpu: 0.0.40
codegen_flags: <defaults>
</compile_context>

<pallas_src>
import functools

import jax
import jax.numpy as jnp
from jax import lax
from jax.experimental import pallas as pl
from jax.experimental.pallas import tpu as pltpu


def _round_up(a, m):
    return (a + m - 1) // m * m


def proxy_anchor_kernel(x_ref, p_ref, pinv_ref, lab_ref,
                        psum_ref, nsum_ref, cnt_ref,
                        *, nb_classes, alpha, mrg):
    ci = pl.program_id(0)   # class-tile index  (parallel)
    bi = pl.program_id(1)   # batch-tile index  (reduction, innermost)

    # --- init per-class accumulators at the first batch tile -----------------
    @pl.when(bi == 0)
    def _init():
        psum_ref[...] = jnp.zeros_like(psum_ref)
        nsum_ref[...] = jnp.zeros_like(nsum_ref)
        cnt_ref[...] = jnp.zeros_like(cnt_ref)

    x = x_ref[...]                      # (tb, D)  bf16
    p = p_ref[...]                      # (tc, D)  bf16
    tb = x.shape[0]
    tc = p.shape[0]

    # --- cosine similarity ----------------------------------------------------
    # Raw bf16 matmul on the MXU with f32 accumulation, then scale the small
    # (tb, tc) result by the row inverse-norms (x norms in-kernel, proxy norms
    # precomputed in the wrapper).
    raw = lax.dot_general(x, p, (((1,), (1,)), ((), ())),
                          preferred_element_type=jnp.float32)        # (tb, tc)
    xf = x.astype(jnp.float32)
    x_inv = lax.rsqrt(jnp.sum(xf * xf, axis=-1, keepdims=True) + 1e-12)  # (tb,1)
    cos = raw * x_inv * pinv_ref[...]                                 # (tb, tc)

    # --- masks from integer labels (no float one-hot) -------------------------
    labels = lab_ref[...]                                             # (tb, 1) i32
    class_id = lax.broadcasted_iota(jnp.int32, (tb, tc), 1) + ci * tc  # (tb, tc)
    pos_m = labels == class_id                      # positives (padded rows: label=-1 never matches)
    valid_row = labels >= 0                         # real batch rows
    valid_cls = class_id < nb_classes               # real (unpadded) classes
    neg_m = jnp.logical_and(jnp.logical_and(valid_row, valid_cls),
                            jnp.logical_not(pos_m))
    pos_f = pos_m.astype(jnp.float32)
    neg_f = neg_m.astype(jnp.float32)

    pos_exp = jnp.exp(-alpha * (cos - mrg))
    neg_exp = jnp.exp(alpha * (cos + mrg))

    # --- batch (axis=0) reductions as ones-row matmuls on the MXU -------------
    ones_row = jnp.ones((1, tb), jnp.float32)
    psum_ref[...] += jnp.dot(ones_row, pos_f * pos_exp,
                             preferred_element_type=jnp.float32)      # (1, tc)
    nsum_ref[...] += jnp.dot(ones_row, neg_f * neg_exp,
                             preferred_element_type=jnp.float32)      # (1, tc)
    cnt_ref[...] += jnp.dot(ones_row, pos_f,
                            preferred_element_type=jnp.float32)       # (1, tc)


def proxy_anchor_loss(x, proxies, t, nb_classes, mrg=0.1, alpha=32.0):
    """Pallas implementation of Proxy_Anchor.forward(X, T)."""
    B, D = x.shape
    C = int(nb_classes)

    tc = 128                                    # class (lane) tile, 128-aligned
    C_pad = _round_up(C, tc)
    tb = min(128, _round_up(B, 16))             # batch (sublane) tile
    B_pad = _round_up(B, tb)

    # bf16 operands for DMA + MXU (halves HBM traffic / VMEM footprint).
    x_pad = jnp.pad(x.astype(jnp.bfloat16), ((0, B_pad - B), (0, 0)))
    p_pad = jnp.pad(proxies.astype(jnp.bfloat16), ((0, C_pad - C), (0, 0)))

    # Proxy inverse norms precomputed once (C*D work) instead of per B tile.
    p_f32 = proxies.astype(jnp.float32)
    pinv = lax.rsqrt(jnp.sum(p_f32 * p_f32, axis=1) + 1e-12)          # (C,)
    pinv_pad = jnp.pad(pinv, (0, C_pad - C)).reshape(1, C_pad)

    # Integer labels instead of a (B, C) float one-hot; padded rows get -1.
    lab_pad = jnp.pad(t.astype(jnp.int32), (0, B_pad - B),
                      constant_values=-1).reshape(B_pad, 1)

    grid = (C_pad // tc, B_pad // tb)
    kernel = functools.partial(proxy_anchor_kernel, nb_classes=C,
                               alpha=float(alpha), mrg=float(mrg))

    out_sd = jax.ShapeDtypeStruct((1, C_pad), jnp.float32)
    psum, nsum, cnt = pl.pallas_call(
        kernel,
        out_shape=(out_sd, out_sd, out_sd),
        grid_spec=pltpu.PrefetchScalarGridSpec(
            num_scalar_prefetch=0,
            grid=grid,
            in_specs=[
                pl.BlockSpec((tb, D), lambda ci, bi: (bi, 0)),   # X tile
                pl.BlockSpec((tc, D), lambda ci, bi: (ci, 0)),   # proxies tile
                pl.BlockSpec((1, tc), lambda ci, bi: (0, ci)),   # proxy inv-norm
                pl.BlockSpec((tb, 1), lambda ci, bi: (bi, 0)),   # int labels
            ],
            out_specs=(
                pl.BlockSpec((1, tc), lambda ci, bi: (0, ci)),   # P_sim_sum
                pl.BlockSpec((1, tc), lambda ci, bi: (0, ci)),   # N_sim_sum
                pl.BlockSpec((1, tc), lambda ci, bi: (0, ci)),   # positives count
            ),
        ),
        compiler_params=pltpu.CompilerParams(
            dimension_semantics=("parallel", "arbitrary")),
    )(x_pad, p_pad, pinv_pad, lab_pad)

    # Tiny finalize in plain JAX on the lane-dense per-class partials.
    p_sim_sum = psum[0, :C]
    n_sim_sum = nsum[0, :C]
    pos_cnt = cnt[0, :C]
    num_valid = jnp.maximum(jnp.sum((pos_cnt > 0.0).astype(jnp.float32)), 1.0)
    pos_term = jnp.sum(jnp.log(1.0 + p_sim_sum)) / num_valid
    neg_term = jnp.sum(jnp.log(1.0 + n_sim_sum)) / float(C)
    return pos_term + neg_term


def proxy_anchor_ref(x, proxies, t, nb_classes, mrg=0.1, alpha=32.0):
    """Pure-JAX f32 reference mirroring the PyTorch forward."""
    def l2n(v):
        return v / jnp.sqrt(jnp.sum(v * v, axis=1, keepdims=True) + 1e-12)

    cos = l2n(x) @ l2n(proxies).T
    P = jax.nn.one_hot(t, nb_classes, dtype=jnp.float32)
    N = 1.0 - P
    pos_exp = jnp.exp(-alpha * (cos - mrg))
    neg_exp = jnp.exp(alpha * (cos + mrg))
    P_sum = jnp.sum(jnp.where(P == 1.0, pos_exp, 0.0), axis=0)
    N_sum = jnp.sum(jnp.where(N == 1.0, neg_exp, 0.0), axis=0)
    num_valid = jnp.maximum(
        jnp.sum((jnp.sum(P, axis=0) != 0).astype(jnp.float32)), 1.0)
    pos_term = jnp.sum(jnp.log(1.0 + P_sum)) / num_valid
    neg_term = jnp.sum(jnp.log(1.0 + N_sum)) / nb_classes
    return pos_term + neg_term


if __name__ == "__main__":
    NB_CLASSES, SZ_EMBED, BATCH = 4, 32, 8
    MRG, ALPHA = 0.1, 32.0

    key = jax.random.PRNGKey(0)
    kx, kp, kt = jax.random.split(key, 3)
    x = jax.random.normal(kx, (BATCH, SZ_EMBED), dtype=jnp.float32)
    proxies = jax.random.normal(kp, (NB_CLASSES, SZ_EMBED), dtype=jnp.float32)
    t = jax.random.randint(kt, (BATCH,), 0, NB_CLASSES)

    loss = proxy_anchor_loss(x, proxies, t, NB_CLASSES, MRG, ALPHA)
    loss = jax.block_until_ready(loss)

    ref = proxy_anchor_ref(x, proxies, t, NB_CLASSES, MRG, ALPHA)
    assert jnp.isfinite(loss), "loss is not finite"
    # bf16 matmul inputs + alpha=32 in the exponent => allow a few % deviation
    # from the all-f32 reference.
    assert jnp.allclose(loss, ref, rtol=3e-2, atol=3e-2), (loss, ref)

    print("KERNEL_OK")
</pallas_src>

<mosaic_0001>
module attributes {stable_mosaic.version = 11 : i64} {
  func.func @proxy_anchor_kernel(%arg0: i32, %arg1: i32, %arg2: memref<16x32xbf16, #tpu.memory_space<vmem>>, %arg3: memref<128x32xbf16, #tpu.memory_space<vmem>>, %arg4: memref<1x128xf32, #tpu.memory_space<vmem>>, %arg5: memref<16x1xi32, #tpu.memory_space<vmem>>, %arg6: memref<1x128xf32, #tpu.memory_space<vmem>>, %arg7: memref<1x128xf32, #tpu.memory_space<vmem>>, %arg8: memref<1x128xf32, #tpu.memory_space<vmem>>) attributes {dimension_semantics = [#tpu.dimension_semantics<parallel>, #tpu.dimension_semantics<arbitrary>], iteration_bounds = array<i64: 1, 1>, scalar_prefetch = 0 : i64, scratch_operands = 0 : i64, tpu.core_type = #tpu.core_type<tc>, window_params = [{transform_indices = @transform_0, window_bounds = array<i64: 16, 32>}, {transform_indices = @transform_1, window_bounds = array<i64: 128, 32>}, {transform_indices = @transform_2, window_bounds = array<i64: 1, 128>}, {transform_indices = @transform_3, window_bounds = array<i64: 16, 1>}, {transform_indices = @transform_4, window_bounds = array<i64: 1, 128>}, {transform_indices = @transform_5, window_bounds = array<i64: 1, 128>}, {transform_indices = @transform_6, window_bounds = array<i64: 1, 128>}]} {
    %c0_i32 = arith.constant 0 : i32
    %0 = arith.cmpi eq, %arg1, %c0_i32 : i32
    %1 = arith.extui %0 : i1 to i32
    %c0_i32_0 = arith.constant 0 : i32
    %2 = arith.cmpi ne, %1, %c0_i32_0 : i32
    scf.if %2 {
      %cst_32 = arith.constant 0.000000e+00 : f32
      %62 = vector.broadcast %cst_32 : f32 to vector<1x128xf32>
      %c0_33 = arith.constant 0 : index
      %c0_34 = arith.constant 0 : index
      %63 = vector.load %arg6[%c0_33, %c0_34] : memref<1x128xf32, #tpu.memory_space<vmem>>, vector<1x128xf32>
      tpu.vector_store %arg6[%c0_33, %c0_34], %62 {strides = array<i32>} : memref<1x128xf32, #tpu.memory_space<vmem>>, vector<1x128xf32>,
      %cst_35 = arith.constant 0.000000e+00 : f32
      %64 = vector.broadcast %cst_35 : f32 to vector<1x128xf32>
      %c0_36 = arith.constant 0 : index
      %c0_37 = arith.constant 0 : index
      %65 = vector.load %arg7[%c0_36, %c0_37] : memref<1x128xf32, #tpu.memory_space<vmem>>, vector<1x128xf32>
      tpu.vector_store %arg7[%c0_36, %c0_37], %64 {strides = array<i32>} : memref<1x128xf32, #tpu.memory_space<vmem>>, vector<1x128xf32>,
      %cst_38 = arith.constant 0.000000e+00 : f32
      %66 = vector.broadcast %cst_38 : f32 to vector<1x128xf32>
      %c0_39 = arith.constant 0 : index
      %c0_40 = arith.constant 0 : index
      %67 = vector.load %arg8[%c0_39, %c0_40] : memref<1x128xf32, #tpu.memory_space<vmem>>, vector<1x128xf32>
      tpu.vector_store %arg8[%c0_39, %c0_40], %66 {strides = array<i32>} : memref<1x128xf32, #tpu.memory_space<vmem>>, vector<1x128xf32>,
    } else {
    }
    %c0 = arith.constant 0 : index
    %c0_1 = arith.constant 0 : index
    %3 = vector.load %arg2[%c0, %c0_1] : memref<16x32xbf16, #tpu.memory_space<vmem>>, vector<16x32xbf16>
    %c0_2 = arith.constant 0 : index
    %c0_3 = arith.constant 0 : index
    %4 = vector.load %arg3[%c0_2, %c0_3] : memref<128x32xbf16, #tpu.memory_space<vmem>>, vector<128x32xbf16>
    %cst = arith.constant dense<0.000000e+00> : vector<16x128xf32>
    %5 = tpu.matmul %3, %4, %cst {dimension_numbers = #tpu.dot_dimension_numbers<[1], [1], [0], [0], [0, 0, 1, 0], [], []>} : vector<16x32xbf16>, vector<128x32xbf16>, vector<16x128xf32> -> vector<16x128xf32>
    %6 = arith.extf %3 : vector<16x32xbf16> to vector<16x32xf32>
    %7 = arith.mulf %6, %6 : vector<16x32xf32>
    %cst_4 = arith.constant dense<0.000000e+00> : vector<16xf32>
    %8 = vector.multi_reduction <add>, %7, %cst_4 [1] : vector<16x32xf32> to vector<16xf32>
    %9 = vector.shape_cast %8 : vector<16xf32> to vector<16x1xf32>
    %cst_5 = arith.constant 9.99999996E-13 : f32
    %10 = vector.broadcast %cst_5 : f32 to vector<16x1xf32>
    %11 = arith.addf %9, %10 : vector<16x1xf32>
    %12 = math.rsqrt %11 : vector<16x1xf32>
    %13 = vector.broadcast %12 : vector<16x1xf32> to vector<16x128xf32>
    %14 = arith.mulf %5, %13 : vector<16x128xf32>
    %c0_6 = arith.constant 0 : index
    %c0_7 = arith.constant 0 : index
    %15 = vector.load %arg4[%c0_6, %c0_7] : memref<1x128xf32, #tpu.memory_space<vmem>>, vector<1x128xf32>
    %16 = vector.broadcast %15 : vector<1x128xf32> to vector<16x128xf32>
    %17 = arith.mulf %14, %16 : vector<16x128xf32>
    %c0_8 = arith.constant 0 : index
    %c0_9 = arith.constant 0 : index
    %18 = vector.load %arg5[%c0_8, %c0_9] : memref<16x1xi32, #tpu.memory_space<vmem>>, vector<16x1xi32>
    %19 = tpu.iota {dimensions = array<i32: 1>} : vector<16x128xi32>
    %c128_i32 = arith.constant 128 : i32
    %20 = arith.muli %arg0, %c128_i32 : i32
    %21 = vector.broadcast %20 : i32 to vector<16x128xi32>
    %22 = arith.addi %19, %21 : vector<16x128xi32>
    %23 = vector.broadcast %18 : vector<16x1xi32> to vector<16x128xi32>
    %24 = arith.cmpi eq, %23, %22 : vector<16x128xi32>
    %c0_i32_10 = arith.constant 0 : i32
    %25 = vector.broadcast %c0_i32_10 : i32 to vector<16x1xi32>
    %26 = arith.cmpi sge, %18, %25 : vector<16x1xi32>
    %c4_i32 = arith.constant 4 : i32
    %27 = vector.broadcast %c4_i32 : i32 to vector<16x128xi32>
    %28 = arith.cmpi slt, %22, %27 : vector<16x128xi32>
    %29 = vector.broadcast %26 : vector<16x1xi1> to vector<16x128xi1>
    %30 = arith.andi %29, %28 : vector<16x128xi1>
    %cst_11 = arith.constant dense<true> : vector<16x128xi1>
    %31 = arith.xori %24, %cst_11 : vector<16x128xi1>
    %32 = arith.andi %30, %31 : vector<16x128xi1>
    %33 = arith.extui %24 : vector<16x128xi1> to vector<16x128xi32>
    %34 = arith.sitofp %33 : vector<16x128xi32> to vector<16x128xf32>
    %35 = arith.extui %32 : vector<16x128xi1> to vector<16x128xi32>
    %36 = arith.sitofp %35 : vector<16x128xi32> to vector<16x128xf32>
    %cst_12 = arith.constant 1.000000e-01 : f32
    %37 = vector.broadcast %cst_12 : f32 to vector<16x128xf32>
    %38 = arith.subf %17, %37 : vector<16x128xf32>
    %cst_13 = arith.constant -3.200000e+01 : f32
    %39 = vector.broadcast %cst_13 : f32 to vector<16x128xf32>
    %40 = arith.mulf %39, %38 : vector<16x128xf32>
    %41 = math.exp %40 : vector<16x128xf32>
    %cst_14 = arith.constant 1.000000e-01 : f32
    %42 = vector.broadcast %cst_14 : f32 to vector<16x128xf32>
    %43 = arith.addf %17, %42 : vector<16x128xf32>
    %cst_15 = arith.constant 3.200000e+01 : f32
    %44 = vector.broadcast %cst_15 : f32 to vector<16x128xf32>
    %45 = arith.mulf %44, %43 : vector<16x128xf32>
    %46 = math.exp %45 : vector<16x128xf32>
    %cst_16 = arith.constant 1.000000e+00 : f32
    %47 = vector.broadcast %cst_16 : f32 to vector<1x16xf32>
    %c0_17 = arith.constant 0 : index
    %c0_18 = arith.constant 0 : index
    %48 = vector.load %arg6[%c0_17, %c0_18] : memref<1x128xf32, #tpu.memory_space<vmem>>, vector<1x128xf32>
    %49 = arith.mulf %34, %41 : vector<16x128xf32>
    %cst_19 = arith.constant dense<0.000000e+00> : vector<1x128xf32>
    %50 = tpu.matmul %47, %49, %cst_19 {dimension_numbers = #tpu.dot_dimension_numbers<[1], [0], [0], [1], [0, 0, 1, 1], [], []>} : vector<1x16xf32>, vector<16x128xf32>, vector<1x128xf32> -> vector<1x128xf32>
    %51 = arith.addf %48, %50 : vector<1x128xf32>
    %c0_20 = arith.constant 0 : index
    %c0_21 = arith.constant 0 : index
    %52 = vector.load %arg6[%c0_20, %c0_21] : memref<1x128xf32, #tpu.memory_space<vmem>>, vector<1x128xf32>
    tpu.vector_store %arg6[%c0_20, %c0_21], %51 {strides = array<i32>} : memref<1x128xf32, #tpu.memory_space<vmem>>, vector<1x128xf32>,
    %c0_22 = arith.constant 0 : index
    %c0_23 = arith.constant 0 : index
    %53 = vector.load %arg7[%c0_22, %c0_23] : memref<1x128xf32, #tpu.memory_space<vmem>>, vector<1x128xf32>
    %54 = arith.mulf %36, %46 : vector<16x128xf32>
    %cst_24 = arith.constant dense<0.000000e+00> : vector<1x128xf32>
    %55 = tpu.matmul %47, %54, %cst_24 {dimension_numbers = #tpu.dot_dimension_numbers<[1], [0], [0], [1], [0, 0, 1, 1], [], []>} : vector<1x16xf32>, vector<16x128xf32>, vector<1x128xf32> -> vector<1x128xf32>
    %56 = arith.addf %53, %55 : vector<1x128xf32>
    %c0_25 = arith.constant 0 : index
    %c0_26 = arith.constant 0 : index
    %57 = vector.load %arg7[%c0_25, %c0_26] : memref<1x128xf32, #tpu.memory_space<vmem>>, vector<1x128xf32>
    tpu.vector_store %arg7[%c0_25, %c0_26], %56 {strides = array<i32>} : memref<1x128xf32, #tpu.memory_space<vmem>>, vector<1x128xf32>,
    %c0_27 = arith.constant 0 : index
    %c0_28 = arith.constant 0 : index
    %58 = vector.load %arg8[%c0_27, %c0_28] : memref<1x128xf32, #tpu.memory_space<vmem>>, vector<1x128xf32>
    %cst_29 = arith.constant dense<0.000000e+00> : vector<1x128xf32>
    %59 = tpu.matmul %47, %34, %cst_29 {dimension_numbers = #tpu.dot_dimension_numbers<[1], [0], [0], [1], [0, 0, 1, 1], [], []>} : vector<1x16xf32>, vector<16x128xf32>, vector<1x128xf32> -> vector<1x128xf32>
    %60 = arith.addf %58, %59 : vector<1x128xf32>
    %c0_30 = arith.constant 0 : index
    %c0_31 = arith.constant 0 : index
    %61 = vector.load %arg8[%c0_30, %c0_31] : memref<1x128xf32, #tpu.memory_space<vmem>>, vector<1x128xf32>
    tpu.vector_store %arg8[%c0_30, %c0_31], %60 {strides = array<i32>} : memref<1x128xf32, #tpu.memory_space<vmem>>, vector<1x128xf32>,
    return
  }
  func.func @transform_0(%arg0: i32, %arg1: i32) -> (i32, i32) {
    %c0_i32 = arith.constant 0 : i32
    %c0_i32_0 = arith.constant 0 : i32
    return %arg1, %c0_i32 : i32, i32
  }
  func.func @transform_1(%arg0: i32, %arg1: i32) -> (i32, i32) {
    %c0_i32 = arith.constant 0 : i32
    %c0_i32_0 = arith.constant 0 : i32
    return %arg0, %c0_i32 : i32, i32
  }
  func.func @transform_2(%arg0: i32, %arg1: i32) -> (i32, i32) {
    %c0_i32 = arith.constant 0 : i32
    %c0_i32_0 = arith.constant 0 : i32
    return %c0_i32, %arg0 : i32, i32
  }
  func.func @transform_3(%arg0: i32, %arg1: i32) -> (i32, i32) {
    %c0_i32 = arith.constant 0 : i32
    %c0_i32_0 = arith.constant 0 : i32
    return %arg1, %c0_i32 : i32, i32
  }
  func.func @transform_4(%arg0: i32, %arg1: i32) -> (i32, i32) {
    %c0_i32 = arith.constant 0 : i32
    %c0_i32_0 = arith.constant 0 : i32
    return %c0_i32, %arg0 : i32, i32
  }
  func.func @transform_5(%arg0: i32, %arg1: i32) -> (i32, i32) {
    %c0_i32 = arith.constant 0 : i32
    %c0_i32_0 = arith.constant 0 : i32
    return %c0_i32, %arg0 : i32, i32
  }
  func.func @transform_6(%arg0: i32, %arg1: i32) -> (i32, i32) {
    %c0_i32 = arith.constant 0 : i32
    %c0_i32_0 = arith.constant 0 : i32
    return %c0_i32, %arg0 : i32, i32
  }
}

</mosaic_0001>

<bundles_post_ra>
// kernel: tpu_custom_call.1
= control target key start
LH: loop header
LB: loop body
LE: loop exit
PB: predicated region body
PF: predicated region fallthrough
CT: control target
= control target key end

     0   :  { %12 = vsyncpa [#allocation3], 0  ;;  %v690_v1 = vmov 0.0   ;;  %vm93_vm0 = vcmask 261120   ;;  %vm691_vm1 = vmmov 0   ;;  %v692_v9 = vmov 0   ;;  %s845_s0 = inlined_call_operand.vmem [shape: bf16[16,32], index: 0, kind: input, shape index: {}]   ;;  %s846_s1 = inlined_call_operand.vmem [shape: bf16[128,32], index: 1, kind: input, shape index: {}]   ;;  %s847_s2 = inlined_call_operand.vmem [shape: f32[1,128], index: 2, kind: input, shape index: {}]   ;;  %s848_s3 = inlined_call_operand.vmem [shape: s32[16,1], index: 3, kind: input, shape index: {}]   ;;  %s849_s4 = inlined_call_operand.hbm [shape: f32[1,128], index: 4, kind: output, shape index: {0}]   ;;  %s850_s5 = inlined_call_operand.hbm [shape: f32[1,128], index: 5, kind: output, shape index: {1}]   ;;  %s851_s6 = inlined_call_operand.hbm [shape: f32[1,128], index: 6, kind: output, shape index: {2}]  }
   0x1   :  { %v604_v0 = vld [vmem:[%s846_s1 + $0x38] sm:$0xff]   ;;  %553 = vmatprep.subr.bf16.mxu0 %v690_v1  ;;  %27 = vst [vmem:[#allocation2] sm:$0x1] %v690_v1  ;;  %28 = vst [vmem:[#allocation4] sm:$0x1] %v690_v1  ;;  %573 = vmatprep.subr.mxu1 %v690_v1  ;;  %v605_v3 = vld [vmem:[%s846_s1 + $0x30] sm:$0xff]  }
   0x2   :  { %29 = vst [vmem:[#allocation6] sm:$0x1] %v690_v1  ;;  %v119_v2 = vsel %vm93_vm0, %v604_v0, 0  ;;  %v116_v4 = vsel %vm93_vm0, %v605_v3, 0  ;;  %v30_v5 = vld [vmem:[%s845_s0] sm:$0xff]   ;;  %v188_v6 = vld [vmem:[%s848_s3 + $0x8] sm:$0xff]  ;;  %569 = vmatprep.mubr.msk.bf16.mxu0 %vm691_vm1, %v690_v1  ;;  %602 = vset.pattern.permute.xlu1 %v692_v9 }
   0x3   :  { %554 = vmatpush3.bf16.xpose.msra.mxu0 %v119_v2  ;;  %v163_v7 = vunpack.c.h.bf16 %v30_v5  ;;  %v162_v8 = vunpack.c.l.bf16 %v30_v5 }
   0x4   :  { %555 = vmatprep.subr.bf16.mxu0 %v690_v1 }
   0x5   :  { %13 = vsyncpa [#allocation5], 0  ;;  %198 = vperm.xlu1 %602, %v188_v6   ;;  %603 = vset.pattern.permute.xlu0 %v692_v9  ;;  %v165_v10 = vmul.f32 %v163_v7, %v163_v7  ;;  %v164_v11 = vmul.f32 %v162_v8, %v162_v8  ;;  %v187_v12 = vld [vmem:[%s848_s3] sm:$0xff]  ;;  %v606_v13 = vld [vmem:[%s846_s1 + $0x28] sm:$0xff]   ;;  %vm203_vm3 = vcmp.ge.s32.totalorder %v188_v6, 0  ;;  %v189_v54 = vlaneseq  ;;  %s696_s19 = smov [#allocation4]  }
   0x6   :  { %577 = vmatprep.mubr.msk.f32.mxu1 %vm691_vm1, %v690_v1  ;;  %vm202_vm2 = vcmp.ge.s32.totalorder %v187_v12, 0  ;;  %v113_v17 = vsel %vm93_vm0, %v606_v13, 0  ;;  %v607_v18 = vld [vmem:[%s846_s1 + $0x20] sm:$0xff]   ;;  %v608_v20 = vld [vmem:[%s846_s1 + $0x18] sm:$0xff]   ;;  %v609_v22 = vld [vmem:[%s846_s1 + $0x10] sm:$0xff]   ;;  %v206_v23 = vsel %vm203_vm3, 1, %v692_v9 }
   0x7   :  { %v169_v14 = vsel %vm93_vm0, %v165_v10, 0.0  ;;  %v166_v15 = vsel %vm93_vm0, %v164_v11, 0.0  ;;  %v205_v16 = vsel %vm202_vm2, 1, %v692_v9  ;;  %v110_v19 = vsel %vm93_vm0, %v607_v18, 0  ;;  %v610_v25 = vld [vmem:[%s846_s1 + $0x8] sm:$0xff]   ;;  %v611_v27 = vld [vmem:[%s846_s1] sm:$0xff]  }
   0x8   :  { %170 = vadd.xlane.f32.xlu0 %v169_v14  ;;  %v107_v21 = vsel %vm93_vm0, %v608_v20, 0  ;;  %v104_v24 = vsel %vm93_vm0, %v609_v22, 0  ;;  %v101_v26 = vsel %vm93_vm0, %v610_v25, 0  ;;  %v98_v28 = vsel %vm93_vm0, %v611_v27, 0  ;;  %v523_v35 = vld [vmem:[%s847_s2] ss:$0 sm:$0xff] }
   0x9   :  { %195 = vperm.xlu1 %602, %v187_v12   ;;  %v190_v59 = vand.u32 127, %v189_v54  ;;  %vm693_vm8 = vmmov 1   ;;  %v694_v13 = vmov 1.0   ;;  %s695_s1 = smov [#allocation2]   ;;  %s488_s20 = sshll.u32 %s696_s19, 4  ;;  %s489_s20 = int_to_ptr.vmem [resolvable:$true] %s488_s20 }
   0xa   :  { %s478_s2 = sshll.u32 %s695_s1, 4  ;;  %s479_s2 = int_to_ptr.vmem [resolvable:$true] %s478_s2 }
   0xb   :  { %556 = vmatpush3.bf16.xpose.msra.mxu0 %v116_v4  ;;  %vm204_vm5 = vcmp.lt.s32.totalorder %v190_v59, 4  ;;  %s626_s21 = scalar_lea.vmem %s479_s2, 16  ;;  %s630_s22 = scalar_lea.vmem %s479_s2, 32 }
   0xc   :  { %557 = vmatprep.subr.bf16.mxu0 %v690_v1  ;;  %167 = vadd.xlane.f32.xlu0 %v166_v15  ;;  %v245_v15 = vld [vmem:[#allocation2] sm:$0x1]  ;;  %p627_p0 = scmp.ne.s32.totalorder %s479_s2, %s626_s21  ;;  %p631_p1 = scmp.lt.s32.totalorder %s479_s2, %s479_s2 }
   0xd   :  { %208 = vperm.xlu1 %602, %v205_v16   ;;  %p632_p2 = scmp.lt.s32.totalorder %s630_s22, %s626_s21 }
   0xf   :  { %p633_p3 = por %p632_p2, %p631_p1 }
  0x11   :  { %p634_p4 = pnand %p633_p3, %p627_p0 }
  0x13   :  { %558 = vmatpush3.bf16.xpose.msra.mxu0 %v113_v17 }
  0x14   :  { %559 = vmatprep.subr.bf16.mxu0 %v690_v1 }
  0x1b   :  { %560 = vmatpush3.bf16.xpose.msra.mxu0 %v110_v19  ;;  %v324_v19 = vld [vmem:[#allocation4] sm:$0x1] }
  0x1c   :  { %561 = vmatprep.subr.bf16.mxu0 %v690_v1 }
  0x22   :  { %211 = vperm.xlu0 %603, %v206_v23  }
  0x23   :  { %562 = vmatpush3.bf16.xpose.msra.mxu0 %v107_v21 }
  0x24   :  { %563 = vmatprep.subr.bf16.mxu0 %v690_v1 }
  0x2b   :  { %564 = vmatpush3.bf16.xpose.msra.mxu0 %v104_v24 }
  0x2c   :  { %565 = vmatprep.subr.bf16.mxu0 %v690_v1 }
  0x33   :  { %566 = vmatpush3.bf16.xpose.msra.mxu0 %v101_v26 }
  0x34   :  { %567 = vmatprep.subr.bf16.mxu0 %v690_v1 }
  0x3b   :  { %568 = vmatpush3.bf16.xpose.msra.mxu0 %v98_v28 }
  0x42   :  { %570 = vmatmul.mubr.msk.bf16.vlgmr.msra.gmra.mxu0 %vm93_vm0, %v30_v5  ;;  %vm248_vm0 = vcmask 130048  }
  0x80   :  { %v199_v44 = vpop.permute.xlu1 %198 }
  0x81   :  { %vm201_vm7 = vcmp.eq.s32.totalorder %v199_v44, %v190_v59 }
  0x82   :  { %vm806_vm12 = vmxor %vm201_vm7, %vm693_vm8  ;;  %v525_v5 = vsel %vm201_vm7, 1.0, %v690_v1 }
  0x84   :  { %v196_v55 = vpop.permute.xlu1 %195 }
  0x85   :  { %vm200_vm4 = vcmp.eq.s32.totalorder %v196_v55, %v190_v59 }
  0x86   :  { %vm797_vm9 = vmxor %vm200_vm4, %vm693_vm8  ;;  %v524_v4 = vsel %vm200_vm4, 1.0, %v690_v1 }
  0x88   :  { %v209_v60 = vpop.permute.xlu1 %208 }
  0x89   :  { %vm213_vm6 = vcmp.eq.s32.totalorder %v209_v60, 1 }
  0x8a   :  { %vm801_vm11 = vmand %vm213_vm6, %vm204_vm5 }
  0x8b   :  { %vm219_vm14 = vmand %vm801_vm11, %vm797_vm9 }
  0x8c   :  { %v526_v10 = vsel %vm219_vm14, 1.0, %v690_v1 }
  0x91   :  { %v171_v29 = vpop.xlane.xlu0 %170 }
  0x92   :  { %v173_v32 = vadd.f32 1e-12, %v171_v29 }
  0x95   :  { %v168_v30 = vpop.xlane.xlu0 %167 }
  0x96   :  { %v172_v31 = vadd.f32 1e-12, %v168_v30 }
  0x98   :  { %614 = vrsqrt.f32 %v172_v31 }
  0x99   :  { %616 = vrsqrt.f32 %v173_v32 }
  0x9d   :  { %v212_v61 = vpop.permute.xlu0 %211 }
  0x9e   :  { %vm214_vm10 = vcmp.eq.s32.totalorder %v212_v61, 1 }
  0x9f   :  { %vm216_vm13 = vmand %vm214_vm10, %vm204_vm5 }
  0xa0   :  { %vm220_vm15 = vmand %vm216_vm13, %vm806_vm12 }
  0xa1   :  { %v527_v11 = vsel %vm220_vm15, 1.0, %v690_v1 }
  0xa5   :  { %v615_v33 = vpop.eup %614 }
  0xa6   :  { %v617_v39 = vpop.eup %616 }
 0x102   :  { %v155_v34 = vpop.f32.mrf.mxu0 }
 0x103   :  { %v176_v36 = vmul.f32 %v615_v33, %v155_v34 }
 0x104   :  { %v571_v37 = vpop.f32.mrf.mxu0 }
 0x105   :  { %v185_v38 = vmul.f32 %v523_v35, %v176_v36 }
 0x106   :  { %v158_v40 = vpop.f32.mrf.mxu0 }
 0x107   :  { %v528_v41 = vadd.f32 -0.1, %v185_v38  ;;  %v177_v42 = vmul.f32 %v617_v39, %v158_v40  ;;  %v237_v46 = vadd.f32 0.1, %v185_v38 }
 0x108   :  { %v572_v43 = vpop.f32.mrf.mxu0 }
 0x109   :  { %v231_v45 = vmul.f32 -32.0, %v528_v41  ;;  %v186_v47 = vmul.f32 %v523_v35, %v177_v42  ;;  %v239_v51 = vmul.f32 32.0, %v237_v46 }
 0x10b   :  { %v529_v48 = vadd.f32 -0.1, %v186_v47  ;;  %v233_v49 = vmul.f32 1.442695, %v231_v45  ;;  %v238_v50 = vadd.f32 0.1, %v186_v47 }
 0x10c   :  { %v241_v58 = vmul.f32 1.442695, %v239_v51 }
 0x10d   :  { %v232_v52 = vmul.f32 -32.0, %v529_v48  ;;  %v240_v53 = vmul.f32 32.0, %v238_v50  ;;  %618 = vpow2.f32 %v233_v49 }
 0x10f   :  { %v235_v56 = vmul.f32 1.442695, %v232_v52  ;;  %v243_v57 = vmul.f32 1.442695, %v240_v53 }
 0x111   :  { %620 = vpow2.f32 %v235_v56 }
 0x112   :  { %622 = vpow2.f32 %v243_v57 }
 0x113   :  { %624 = vpow2.f32 %v241_v58 }
 0x11a   :  { %v619_v2 = vpop.eup %618 }
 0x11b   :  { %v246_v8 = vmul.f32 %v619_v2, %v524_v4 }
 0x11e   :  { %v621_v3 = vpop.eup %620 }
 0x11f   :  { %v247_v6 = vmul.f32 %v621_v3, %v525_v5  ;;  %v623_v7 = vpop.eup %622 }
 0x120   :  { %v625_v9 = vpop.eup %624  ;;  %v326_v12 = vmul.f32 %v623_v7, %v527_v11 }
 0x121   :  { %574 = vmatpush3.msra.mxu1 %v247_v6  ;;  %v325_v14 = vmul.f32 %v625_v9, %v526_v10 }
 0x122   :  { %575 = vmatprep.subr.mxu1 %v690_v1 }
 0x123   :  { %576 = vmatpush3.msra.mxu1 %v246_v8 }
 0x124   :  { %578 = vmatmul.mubr.msk.f32.vlgmr.msra.gmra.mxu1 %vm248_vm0, %v694_v13  ;;  %580 = vmatprep.subr.mxu1 %v690_v1 }
 0x125   :  { %581 = vmatpush3.msra.mxu1 %v326_v12  ;;  %584 = vmatprep.mubr.msk.f32.mxu1 %vm691_vm1, %v690_v1 }
 0x126   :  { %582 = vmatprep.subr.mxu1 %v690_v1 }
 0x127   :  { %583 = vmatpush3.msra.mxu1 %v325_v14 }
 0x128   :  { %585 = vmatmul.mubr.msk.f32.vlgmr.msra.gmra.mxu1 %vm248_vm0, %v694_v13  ;;  %587 = vmatprep.subr.mxu1 %v690_v1 }
 0x129   :  { %588 = vmatpush3.msk.msra.mxu1 %vm201_vm7, %v694_v13  ;;  %591 = vmatprep.mubr.msk.f32.mxu1 %vm691_vm1, %v690_v1 }
 0x12a   :  { %589 = vmatprep.subr.mxu1 %v690_v1 }
 0x12b   :  { %590 = vmatpush3.msk.msra.mxu1 %vm200_vm4, %v694_v13 }
 0x12c   :  { %592 = vmatmul.mubr.msk.f32.vlgmr.msra.gmra.mxu1 %vm248_vm0, %v694_v13 }
 0x1e4   :  { %v318_v16 = vpop.f32.mrf.mxu1 }
 0x1e5   :  { %v322_v17 = vadd.f32 %v318_v16, %v245_v15 }
 0x1e6   :  { %v579_v18 = vpop.f32.mrf.mxu1 }
 0x1e7   :  { %323 = vst [vmem:[#allocation2] sm:$0x1] %v322_v17 }
 0x1e8   :  { %v393_v20 = vpop.f32.mrf.mxu1 }
 0x1e9   :  { %637 = shalt.err (!%p634_p4)
}
 0x1ea   :  { %481 = dma.vmem_to_hbm [thread:$0]  %s479_s2, 16, %s849_s4, [#allocation3]   ;;  %v397_v1 = vadd.f32 %v393_v20, %v324_v19  ;;  %v586_v21 = vpop.f32.mrf.mxu1  ;;  %v399_v22 = vld [vmem:[#allocation6] sm:$0x1] }
 0x1eb   :  { %s697_s25 = smov [#allocation6]   ;;  %s646_s27 = scalar_lea.vmem %s489_s20, 16 }
 0x1ec   :  { %s498_s26 = sshll.u32 %s697_s25, 4  ;;  %398 = vst [vmem:[#allocation4] sm:$0x1] %v397_v1  ;;  %v466_v23 = vpop.f32.mrf.mxu1  ;;  %p647_p5 = scmp.ne.s32.totalorder %s489_s20, %s646_s27  ;;  %s499_s26 = int_to_ptr.vmem [resolvable:$true] %s498_s26 }
 0x1ed   :  { %s650_s28 = scalar_lea.vmem %s489_s20, 32  ;;  %p651_p6 = scmp.lt.s32.totalorder %s489_s20, %s489_s20 }
 0x1ee   :  { %p652_p7 = scmp.lt.s32.totalorder %s650_s28, %s646_s27 }
 0x1f0   :  { %p653_p8 = por %p652_p7, %p651_p6 }
 0x1f2   :  { %p654_p9 = pnand %p653_p8, %p647_p5 }
 0x1f4   :  { %657 = shalt.err (!%p654_p9)
}
 0x1f5   :  { %491 = dma.vmem_to_hbm [thread:$0]  %s489_s20, 16, %s850_s5, [#allocation5]   ;;  %v470_v24 = vadd.f32 %v466_v23, %v399_v22  ;;  %v593_v25 = vpop.f32.mrf.mxu1 }
 0x1f6   :  { %s666_s4 = scalar_lea.vmem %s499_s26, 16  ;;  %s670_s30 = scalar_lea.vmem %s499_s26, 32 }
 0x1f7   :  { %471 = vst [vmem:[#allocation6] sm:$0x1] %v470_v24  ;;  %p667_p10 = scmp.ne.s32.totalorder %s499_s26, %s666_s4  ;;  %p671_p11 = scmp.lt.s32.totalorder %s499_s26, %s499_s26 }
 0x1f8   :  { %p672_p12 = scmp.lt.s32.totalorder %s670_s30, %s666_s4 }
 0x1fa   :  { %p673_p13 = por %p672_p12, %p671_p11 }
 0x1fc   :  { %p674_p0 = pnand %p673_p13, %p667_p10 }
 0x1fe   :  { %677 = shalt.err (!%p674_p0)
}
 0x1ff   :  { %501 = dma.vmem_to_hbm [thread:$0]  %s499_s26, 16, %s851_s6, [#allocation5]  }
 0x200   :  { %686 = dma.done.wait [#allocation3], 16  }
 0x201   :  { %687 = vsyncadd [#allocation3], 4294967280 }
 0x202   :  { %688 = dma.done.wait [#allocation5], 32  }
 0x203   :  { %689 = vsyncadd [#allocation5], 4294967264 }
 0x204   :  { %511 = vsyncpa [#allocation3], 1 }
 0x205   :  { %512 = vsyncpa [#allocation5], 1 }

</bundles_post_ra>
